<compile_context>
chip_gen: v6e
topology: v6e:2x2x1
jax: 0.10.0
libtpu: 0.0.40
codegen_flags: <defaults>
</compile_context>

<pallas_src>
import functools

import jax
import jax.numpy as jnp
from jax import lax
from jax.experimental import pallas as pl
from jax.experimental.pallas import tpu as pltpu

_EPS = 1e-5


# ---------------------------------------------------------------------------
# Helpers
# ---------------------------------------------------------------------------
def _round_up(v, m):
    return ((v + m - 1) // m) * m


def _valid_rows(step, *, tile_rows, n_real, n_pad):
    """(tile_rows, 1) bool mask of real (non padded) rows in this tile.

    tile_rows divides n_pad, so a tile lies inside one batch and its within-batch
    start offset is (step * tile_rows) % n_pad.
    """
    off = (step * tile_rows) % n_pad
    row = lax.broadcasted_iota(jnp.int32, (tile_rows, 1), 0)
    return (off + row) < n_real


# ---------------------------------------------------------------------------
# Kernels
# ---------------------------------------------------------------------------
def _conv1_stats_kernel(x_ref, w1_ref, b1_ref, stats_ref, *,
                        tile_rows, n_real, n_pad):
    """BN1 statistics of r1 = ReLU(x @ W1 + b1); r1 is never stored."""
    i = pl.program_id(0)

    @pl.when(i == 0)
    def _init():
        stats_ref[...] = jnp.zeros_like(stats_ref)

    r = jnp.maximum(
        jnp.dot(x_ref[...], w1_ref[...], preferred_element_type=jnp.float32)
        + b1_ref[...], 0.0)
    if n_pad != n_real:
        r = jnp.where(_valid_rows(i, tile_rows=tile_rows, n_real=n_real,
                                  n_pad=n_pad), r, 0.0)
    stats_ref[0:1, :] = stats_ref[0:1, :] + jnp.sum(r, axis=0, keepdims=True)
    stats_ref[1:2, :] = stats_ref[1:2, :] + jnp.sum(r * r, axis=0, keepdims=True)


def _conv2_stats_kernel(x_ref, w1_ref, b1_ref, w2_ref, b2_ref, stats_ref, *,
                        tile_rows, n_real, n_pad):
    """Recompute conv1, then BN2 statistics of r2 (BN1 pre-folded into w2/b2)."""
    i = pl.program_id(0)

    @pl.when(i == 0)
    def _init():
        stats_ref[...] = jnp.zeros_like(stats_ref)

    r1 = jnp.maximum(
        jnp.dot(x_ref[...], w1_ref[...], preferred_element_type=jnp.float32)
        + b1_ref[...], 0.0)
    r2 = jnp.maximum(
        jnp.dot(r1.astype(w2_ref.dtype), w2_ref[...],
                preferred_element_type=jnp.float32) + b2_ref[...], 0.0)
    if n_pad != n_real:
        r2 = jnp.where(_valid_rows(i, tile_rows=tile_rows, n_real=n_real,
                                   n_pad=n_pad), r2, 0.0)
    stats_ref[0:1, :] = stats_ref[0:1, :] + jnp.sum(r2, axis=0, keepdims=True)
    stats_ref[1:2, :] = stats_ref[1:2, :] + jnp.sum(r2 * r2, axis=0, keepdims=True)


def _conv3_pool_kernel(x_ref, w1_ref, b1_ref, w2_ref, b2_ref, w3_ref, b3_ref,
                       stats_ref, max_ref, min_ref, *,
                       tile_rows, n_real, n_pad):
    """Recompute conv1/conv2, conv3 chunk + BN3 stats + streaming per-batch max/min.

    Grid = (channel chunk j [parallel], row tile i [arbitrary]); all three outputs
    are per-chunk resident accumulators across i.
    """
    i = pl.program_id(1)

    @pl.when(i == 0)
    def _init():
        stats_ref[...] = jnp.zeros_like(stats_ref)
        max_ref[...] = jnp.full_like(max_ref, -jnp.inf)
        min_ref[...] = jnp.full_like(min_ref, jnp.inf)

    r1 = jnp.maximum(
        jnp.dot(x_ref[...], w1_ref[...], preferred_element_type=jnp.float32)
        + b1_ref[...], 0.0)
    r2 = jnp.maximum(
        jnp.dot(r1.astype(w2_ref.dtype), w2_ref[...],
                preferred_element_type=jnp.float32) + b2_ref[...], 0.0)
    r3 = jnp.maximum(
        jnp.dot(r2.astype(w3_ref.dtype), w3_ref[...],
                preferred_element_type=jnp.float32) + b3_ref[...], 0.0)

    if n_pad != n_real:
        valid = _valid_rows(i, tile_rows=tile_rows, n_real=n_real, n_pad=n_pad)
        r3z = jnp.where(valid, r3, 0.0)            # r3 >= 0 so zeros never win max
        tmin = jnp.min(jnp.where(valid, r3, jnp.inf), axis=0, keepdims=True)
    else:
        r3z = r3
        tmin = jnp.min(r3, axis=0, keepdims=True)

    # Global BN3 statistics over all real rows (two slice-adds, no concat).
    stats_ref[0:1, :] = stats_ref[0:1, :] + jnp.sum(r3z, axis=0, keepdims=True)
    stats_ref[1:2, :] = stats_ref[1:2, :] + jnp.sum(r3z * r3z, axis=0, keepdims=True)

    # Streaming per-batch max / min: single-row read-modify-write (tile never
    # straddles a batch since tile_rows divides n_pad).
    b_idx = (i * tile_rows) // n_pad
    tmax = jnp.max(r3z, axis=0, keepdims=True)
    max_ref[pl.ds(b_idx, 1), :] = jnp.maximum(max_ref[pl.ds(b_idx, 1), :], tmax)
    min_ref[pl.ds(b_idx, 1), :] = jnp.minimum(min_ref[pl.ds(b_idx, 1), :], tmin)


def _fc_tail_kernel(stats_ref, maxv_ref, minv_ref, g3_ref, be3_ref,
                    w4_ref, b4_ref, g4_ref, be4_ref,
                    w5_ref, b5_ref, g5_ref, be5_ref,
                    w6_ref, b6_ref, iden_ref, out_ref, *, count):
    """BN3 apply to the pooled values + linear1/bn4 + linear2/bn5 + linear3 + iden."""
    inv_n = 1.0 / count
    mu3 = stats_ref[0:1, :] * inv_n
    var3 = jnp.maximum(stats_ref[1:2, :] * inv_n - mu3 * mu3, 0.0)
    a3 = g3_ref[...] * lax.rsqrt(var3 + _EPS)
    c3 = be3_ref[...] - a3 * mu3
    # max over points of (a*y + c) == a*max(y)+c if a>=0 else a*min(y)+c.
    pooled = a3 * jnp.where(a3 >= 0.0, maxv_ref[...], minv_ref[...]) + c3  # (B,1024)

    def linear_relu_bn(h, w_r, b_r, g_r, be_r):
        z = jnp.maximum(
            jnp.dot(h, w_r[...], preferred_element_type=jnp.float32) + b_r[...], 0.0)
        mu = jnp.mean(z, axis=0, keepdims=True)
        var = jnp.mean((z - mu) * (z - mu), axis=0, keepdims=True)
        return g_r[...] * (z - mu) * lax.rsqrt(var + _EPS) + be_r[...]

    h4 = linear_relu_bn(pooled, w4_ref, b4_ref, g4_ref, be4_ref)   # (B, 512)
    h5 = linear_relu_bn(h4, w5_ref, b5_ref, g5_ref, be5_ref)       # (B, 256)
    out_ref[...] = (jnp.dot(h5, w6_ref[...], preferred_element_type=jnp.float32)
                    + b6_ref[...] + iden_ref[...])                 # lane-dense slab


# ---------------------------------------------------------------------------
# Wrapper
# ---------------------------------------------------------------------------
def _bn_affine(stats, gamma, beta, count):
    """Training-mode BN as per-channel affine y -> a*y + c from global sum/sumsq."""
    mu = stats[0:1, :] / count
    var = jnp.maximum(stats[1:2, :] / count - mu * mu, 0.0)   # biased variance
    a = gamma * lax.rsqrt(var + _EPS)
    return a, beta - a * mu


def _vmem_limit_bytes():
    """Per-generation VMEM budget: ~3/4 of physical, in [32 MiB, 96 MiB]."""
    cap = 64 * 1024 * 1024
    try:
        info = pltpu.get_tpu_info()
        cap = int(getattr(info, "vmem_capacity_bytes", cap)) or cap
    except Exception:
        pass
    return int(min(96 * 1024 * 1024, max(32 * 1024 * 1024, (cap * 3) // 4)))


def _default_conv3_chunks():
    """2 output-channel chunks on v7x (2 TensorCores/chip) so the 'parallel' grid
    axis of pass C shards conv3 across both cores; 1 elsewhere (1 TC/chip)."""
    try:
        kind = jax.devices()[0].device_kind.lower()
        if "v7" in kind or "7x" in kind:
            return 2
    except Exception:
        pass
    return 1


def tnet_forward(x, params, dim, num_points, *, tile_rows=None,
                 compute_dtype=jnp.bfloat16, conv3_chunks=None):
    """x: (B, dim, N) float32 (PyTorch NCL layout). Returns (B, dim, dim)."""
    B = x.shape[0]
    N = num_points
    assert x.shape == (B, dim, N)
    cd = jnp.dtype(compute_dtype)

    if tile_rows is None:
        tile_rows = min(1024, _round_up(N, 16))
    tile_rows = max(16, _round_up(tile_rows, 16))   # bf16 (16,128) sublane packing
    n_pad = _round_up(N, tile_rows)                 # per-batch pad: tiles never straddle
    rows_pad = B * n_pad
    n_tiles = rows_pad // tile_rows
    count = float(B * N)                            # real rows for BN statistics

    if conv3_chunks is None:
        conv3_chunks = _default_conv3_chunks()
    assert 1024 % conv3_chunks == 0 and (1024 // conv3_chunks) % 128 == 0
    cchunk = 1024 // conv3_chunks

    (w1, b1, g1, be1, w2, b2, g2, be2, w3, b3, g3, be3,
     w4, b4, g4, be4, w5, b5, g5, be5, w6, b6) = params

    # points-major rows, padded per batch, cast once to the compute dtype so every
    # pass streams x as bf16 (x is tiny; nothing bigger ever round-trips HBM).
    xt = jnp.transpose(x, (0, 2, 1))                           # (B, N, dim)
    if n_pad != N:
        xt = jnp.pad(xt, ((0, 0), (0, n_pad - N), (0, 0)))
    x_rows = xt.reshape(rows_pad, dim).astype(cd)

    w1c = w1.astype(cd)
    b1f = b1.astype(jnp.float32)

    vmem_limit = _vmem_limit_bytes()
    seq_params = pltpu.CompilerParams(
        dimension_semantics=("arbitrary",), vmem_limit_bytes=vmem_limit)

    tile_x = pl.BlockSpec((tile_rows, dim), lambda i: (i, 0))
    const1 = lambda i: (0, 0)

    # ---- pass A: conv1, BN1 stats only (r1 never stored) ---------------------
    stats1 = pl.pallas_call(
        functools.partial(_conv1_stats_kernel, tile_rows=tile_rows,
                          n_real=N, n_pad=n_pad),
        grid=(n_tiles,),
        in_specs=[tile_x,
                  pl.BlockSpec((dim, 128), const1),
                  pl.BlockSpec((1, 128), const1)],
        out_specs=pl.BlockSpec((2, 128), const1),
        out_shape=jax.ShapeDtypeStruct((2, 128), jnp.float32),
        compiler_params=seq_params,
        cost_estimate=pl.CostEstimate(
            flops=2 * rows_pad * dim * 128, transcendentals=0,
            bytes_accessed=rows_pad * dim * cd.itemsize + 2 * 128 * 4),
    )(x_rows, w1c, b1f)
    a1, c1 = _bn_affine(stats1, g1, be1, count)

    # BN1 folded into conv2: BN1(r1) @ W2 == r1 @ (a1^T * W2) + (c1 @ W2)
    w2f = (w2 * jnp.transpose(a1)).astype(cd)
    b2f = (c1 @ w2 + b2).astype(jnp.float32)

    # ---- pass B: recompute conv1+conv2, BN2 stats only (r2 never stored) ------
    stats2 = pl.pallas_call(
        functools.partial(_conv2_stats_kernel, tile_rows=tile_rows,
                          n_real=N, n_pad=n_pad),
        grid=(n_tiles,),
        in_specs=[tile_x,
                  pl.BlockSpec((dim, 128), const1),
                  pl.BlockSpec((1, 128), const1),
                  pl.BlockSpec((128, 256), const1),
                  pl.BlockSpec((1, 256), const1)],
        out_specs=pl.BlockSpec((2, 256), const1),
        out_shape=jax.ShapeDtypeStruct((2, 256), jnp.float32),
        compiler_params=seq_params,
        cost_estimate=pl.CostEstimate(
            flops=2 * rows_pad * (dim * 128 + 128 * 256), transcendentals=0,
            bytes_accessed=rows_pad * dim * cd.itemsize + 2 * 256 * 4),
    )(x_rows, w1c, b1f, w2f, b2f)
    a2, c2 = _bn_affine(stats2, g2, be2, count)

    w3f = (w3 * jnp.transpose(a2)).astype(cd)
    b3f = (c2 @ w3 + b3).astype(jnp.float32)

    # ---- pass C: recompute conv1+conv2, conv3 + streaming pool + BN3 stats ----
    tile_x2 = pl.BlockSpec((tile_rows, dim), lambda j, i: (i, 0))
    const2 = lambda j, i: (0, 0)
    chunk2 = lambda j, i: (0, j)
    stats3, maxv, minv = pl.pallas_call(
        functools.partial(_conv3_pool_kernel, tile_rows=tile_rows,
                          n_real=N, n_pad=n_pad),
        grid=(conv3_chunks, n_tiles),
        in_specs=[tile_x2,
                  pl.BlockSpec((dim, 128), const2),
                  pl.BlockSpec((1, 128), const2),
                  pl.BlockSpec((128, 256), const2),
                  pl.BlockSpec((1, 256), const2),
                  pl.BlockSpec((256, cchunk), chunk2),
                  pl.BlockSpec((1, cchunk), chunk2)],
        out_specs=[pl.BlockSpec((2, cchunk), chunk2),
                   pl.BlockSpec((B, cchunk), chunk2),
                   pl.BlockSpec((B, cchunk), chunk2)],
        out_shape=[jax.ShapeDtypeStruct((2, 1024), jnp.float32),
                   jax.ShapeDtypeStruct((B, 1024), jnp.float32),
                   jax.ShapeDtypeStruct((B, 1024), jnp.float32)],
        compiler_params=pltpu.CompilerParams(
            dimension_semantics=("parallel", "arbitrary"),
            vmem_limit_bytes=vmem_limit),
        cost_estimate=pl.CostEstimate(
            flops=2 * rows_pad * (conv3_chunks * (dim * 128 + 128 * 256)
                                  + 256 * 1024),
            transcendentals=0,
            bytes_accessed=conv3_chunks * rows_pad * dim * cd.itemsize
            + 256 * 1024 * cd.itemsize + (2 + 2 * B) * 1024 * 4),
    )(x_rows, w1c, b1f, w2f, b2f, w3f, b3f)

    # ---- tiny FC tail in its own pallas_call (B rows, f32, lane-dense output) --
    out_cols = _round_up(dim * dim, 128)
    w6p = jnp.zeros((256, out_cols), jnp.float32).at[:, :dim * dim].set(w6)
    b6p = jnp.zeros((1, out_cols), jnp.float32).at[:, :dim * dim].set(b6)
    idenp = jnp.zeros((1, out_cols), jnp.float32).at[:, :dim * dim].set(
        jnp.eye(dim, dtype=jnp.float32).reshape(1, dim * dim))

    full = lambda i: (0, 0)
    fspec = lambda shape: pl.BlockSpec(shape, full)
    out_pad = pl.pallas_call(
        functools.partial(_fc_tail_kernel, count=count),
        grid=(1,),
        in_specs=[fspec((2, 1024)), fspec((B, 1024)), fspec((B, 1024)),
                  fspec((1, 1024)), fspec((1, 1024)),
                  fspec((1024, 512)), fspec((1, 512)), fspec((1, 512)),
                  fspec((1, 512)),
                  fspec((512, 256)), fspec((1, 256)), fspec((1, 256)),
                  fspec((1, 256)),
                  fspec((256, out_cols)), fspec((1, out_cols)),
                  fspec((1, out_cols))],
        out_specs=pl.BlockSpec((B, out_cols), full),
        out_shape=jax.ShapeDtypeStruct((B, out_cols), jnp.float32),
        compiler_params=pltpu.CompilerParams(
            dimension_semantics=("arbitrary",), vmem_limit_bytes=vmem_limit),
    )(stats3, maxv, minv, g3, be3,
      w4, b4, g4, be4, w5, b5, g5, be5, w6p, b6p, idenp)

    return out_pad[:, :dim * dim].reshape(B, dim, dim)


# ---------------------------------------------------------------------------
# Parameters, pure-JAX reference, test
# ---------------------------------------------------------------------------
def _uniform(key, shape, bound):
    return jax.random.uniform(key, shape, jnp.float32, minval=-bound, maxval=bound)


def init_tnet_params(key, dim):
    """PyTorch-default-like init; weights stored as (in, out)."""
    sizes = [(dim, 128), (128, 256), (256, 1024),
             (1024, 512), (512, 256), (256, dim * dim)]
    params = []
    for i, (fan_in, fan_out) in enumerate(sizes):
        key, kw, kb = jax.random.split(key, 3)
        bound = 1.0 / (fan_in ** 0.5)
        params += [_uniform(kw, (fan_in, fan_out), bound),
                   _uniform(kb, (1, fan_out), bound)]
        if i < 5:                       # layers followed by bn1..bn5
            params += [jnp.ones((1, fan_out), jnp.float32),
                       jnp.zeros((1, fan_out), jnp.float32)]
    return params


def tnet_reference(x, params, dim, num_points):
    """Pure-JAX float32 reference with PyTorch training-mode semantics."""
    B, N = x.shape[0], num_points
    (w1, b1, g1, be1, w2, b2, g2, be2, w3, b3, g3, be3,
     w4, b4, g4, be4, w5, b5, g5, be5, w6, b6) = params
    hp = lax.Precision.HIGHEST

    def block(h, w, b, g, be):
        y = jnp.maximum(jnp.dot(h, w, precision=hp) + b, 0.0)
        mu = jnp.mean(y, axis=0, keepdims=True)
        var = jnp.mean((y - mu) ** 2, axis=0, keepdims=True)
        return g * (y - mu) * lax.rsqrt(var + _EPS) + be

    h = jnp.transpose(x, (0, 2, 1)).reshape(B * N, dim)
    h = block(h, w1, b1, g1, be1)
    h = block(h, w2, b2, g2, be2)
    h = block(h, w3, b3, g3, be3)
    pooled = jnp.max(h.reshape(B, N, 1024), axis=1)
    h = block(pooled, w4, b4, g4, be4)
    h = block(h, w5, b5, g5, be5)
    y = jnp.dot(h, w6, precision=hp) + b6
    y = y + jnp.eye(dim, dtype=jnp.float32).reshape(1, dim * dim)
    return y.reshape(B, dim, dim)


if __name__ == "__main__":
    dim = 4
    num_points = 100    # deliberately NOT a multiple of the tile: exercises pad/mask
    B = 4

    key = jax.random.PRNGKey(0)
    kx, kp = jax.random.split(key)
    x = jax.random.normal(kx, (B, dim, num_points), jnp.float32)
    params = init_tnet_params(kp, dim)

    ref = tnet_reference(x, params, dim, num_points)

    # f32 compute path: validates tiling, per-batch padding masks, streaming
    # stats / max-min pooling and BN folding.
    out_f32 = jax.block_until_ready(
        tnet_forward(x, params, dim, num_points, tile_rows=32,
                     compute_dtype=jnp.float32, conv3_chunks=1))
    assert out_f32.shape == (B, dim, dim)
    assert bool(jnp.all(jnp.isfinite(out_f32)))
    assert float(jnp.max(jnp.abs(out_f32 - ref))) < 2e-1

    # Chunked conv3 (the v7x two-TensorCore path) must match the unchunked result.
    out_f32_c2 = jax.block_until_ready(
        tnet_forward(x, params, dim, num_points, tile_rows=32,
                     compute_dtype=jnp.float32, conv3_chunks=2))
    assert float(jnp.max(jnp.abs(out_f32_c2 - out_f32))) < 1e-4

    # Default path (bf16 compute, auto tile / chunk / vmem selection): sanity check.
    out_bf16 = jax.block_until_ready(
        tnet_forward(x, params, dim, num_points))
    assert out_bf16.shape == (B, dim, dim)
    assert bool(jnp.all(jnp.isfinite(out_bf16)))
    assert float(jnp.max(jnp.abs(out_bf16 - ref))) < 1.0

    print("KERNEL_OK")
</pallas_src>

<mosaic_0001>
module attributes {stable_mosaic.version = 11 : i64} {
  func.func @_conv1_stats_kernel(%arg0: i32, %arg1: memref<32x4xf32, #tpu.memory_space<vmem>>, %arg2: memref<4x128xf32, #tpu.memory_space<vmem>>, %arg3: memref<1x128xf32, #tpu.memory_space<vmem>>, %arg4: memref<2x128xf32, #tpu.memory_space<vmem>>) attributes {dimension_semantics = [#tpu.dimension_semantics<arbitrary>], iteration_bounds = array<i64: 16>, scalar_prefetch = 0 : i64, scratch_operands = 0 : i64, tpu.core_type = #tpu.core_type<tc>, window_params = [{transform_indices = @transform_0, window_bounds = array<i64: 32, 4>}, {pipeline_mode = #tpu.pipeline_mode<synchronous>, transform_indices = @transform_1, window_bounds = array<i64: 4, 128>}, {pipeline_mode = #tpu.pipeline_mode<synchronous>, transform_indices = @transform_2, window_bounds = array<i64: 1, 128>}, {pipeline_mode = #tpu.pipeline_mode<synchronous>, transform_indices = @transform_3, window_bounds = array<i64: 2, 128>}]} {
    %c0_i32 = arith.constant 0 : i32
    %0 = arith.cmpi eq, %arg0, %c0_i32 : i32
    %1 = arith.extui %0 : i1 to i32
    %c0_i32_0 = arith.constant 0 : i32
    %2 = arith.cmpi ne, %1, %c0_i32_0 : i32
    scf.if %2 {
      %cst_21 = arith.constant 0.000000e+00 : f32
      %42 = vector.broadcast %cst_21 : f32 to vector<2x128xf32>
      %c0_22 = arith.constant 0 : index
      %c0_23 = arith.constant 0 : index
      %43 = vector.load %arg4[%c0_22, %c0_23] : memref<2x128xf32, #tpu.memory_space<vmem>>, vector<2x128xf32>
      tpu.vector_store %arg4[%c0_22, %c0_23], %42 {strides = array<i32>} : memref<2x128xf32, #tpu.memory_space<vmem>>, vector<2x128xf32>,
    } else {
    }
    %c0 = arith.constant 0 : index
    %c0_1 = arith.constant 0 : index
    %3 = vector.load %arg1[%c0, %c0_1] : memref<32x4xf32, #tpu.memory_space<vmem>>, vector<32x4xf32>
    %c0_2 = arith.constant 0 : index
    %c0_3 = arith.constant 0 : index
    %4 = vector.load %arg2[%c0_2, %c0_3] : memref<4x128xf32, #tpu.memory_space<vmem>>, vector<4x128xf32>
    %cst = arith.constant dense<0.000000e+00> : vector<32x128xf32>
    %5 = tpu.matmul %3, %4, %cst {dimension_numbers = #tpu.dot_dimension_numbers<[1], [0], [0], [1], [0, 0, 1, 1], [], []>} : vector<32x4xf32>, vector<4x128xf32>, vector<32x128xf32> -> vector<32x128xf32>
    %c0_4 = arith.constant 0 : index
    %c0_5 = arith.constant 0 : index
    %6 = vector.load %arg3[%c0_4, %c0_5] : memref<1x128xf32, #tpu.memory_space<vmem>>, vector<1x128xf32>
    %7 = vector.broadcast %6 : vector<1x128xf32> to vector<32x128xf32>
    %8 = arith.addf %5, %7 : vector<32x128xf32>
    %cst_6 = arith.constant 0.000000e+00 : f32
    %9 = vector.broadcast %cst_6 : f32 to vector<32x128xf32>
    %10 = arith.maximumf %8, %9 : vector<32x128xf32>
    %c32_i32 = arith.constant 32 : i32
    %11 = arith.muli %arg0, %c32_i32 : i32
    %c128_i32 = arith.constant 128 : i32
    %c0_i32_7 = arith.constant 0 : i32
    %12 = arith.cmpi eq, %c128_i32, %c0_i32_7 : i32
    %c1_i32 = arith.constant 1 : i32
    %13 = arith.select %12, %c1_i32, %c128_i32 : i32
    %14 = arith.remsi %11, %13 : i32
    %c0_i32_8 = arith.constant 0 : i32
    %15 = arith.cmpi ne, %14, %c0_i32_8 : i32
    %c0_i32_9 = arith.constant 0 : i32
    %16 = arith.cmpi slt, %14, %c0_i32_9 : i32
    %c0_i32_10 = arith.constant 0 : i32
    %17 = arith.cmpi slt, %13, %c0_i32_10 : i32
    %18 = arith.xori %16, %17 : i1
    %19 = arith.andi %18, %15 : i1
    %20 = arith.addi %14, %13 : i32
    %21 = arith.select %19, %20, %14 : i32
    %22 = tpu.iota {dimensions = array<i32: 0>} : vector<32x1xi32>
    %23 = vector.broadcast %21 : i32 to vector<32x1xi32>
    %24 = arith.addi %23, %22 : vector<32x1xi32>
    %c100_i32 = arith.constant 100 : i32
    %25 = vector.broadcast %c100_i32 : i32 to vector<32x1xi32>
    %26 = arith.cmpi slt, %24, %25 : vector<32x1xi32>
    %cst_11 = arith.constant 0.000000e+00 : f32
    %27 = vector.shape_cast %26 : vector<32x1xi1> to vector<32x1xi1>
    %28 = vector.broadcast %27 : vector<32x1xi1> to vector<32x128xi1>
    %29 = vector.broadcast %cst_11 : f32 to vector<32x128xf32>
    %30 = arith.select %28, %10, %29 : vector<32x128xi1>, vector<32x128xf32>
    %c0_12 = arith.constant 0 : index
    %c0_13 = arith.constant 0 : index
    %31 = vector.load %arg4[%c0_12, %c0_13] : memref<2x128xf32, #tpu.memory_space<vmem>>, vector<1x128xf32>
    %cst_14 = arith.constant dense<0.000000e+00> : vector<128xf32>
    %32 = vector.multi_reduction <add>, %30, %cst_14 [0] : vector<32x128xf32> to vector<128xf32>
    %33 = vector.shape_cast %32 : vector<128xf32> to vector<1x128xf32>
    %34 = arith.addf %31, %33 : vector<1x128xf32>
    %c0_15 = arith.constant 0 : index
    %c0_16 = arith.constant 0 : index
    %35 = vector.load %arg4[%c0_15, %c0_16] : memref<2x128xf32, #tpu.memory_space<vmem>>, vector<1x128xf32>
    tpu.vector_store %arg4[%c0_15, %c0_16], %34 {strides = array<i32>} : memref<2x128xf32, #tpu.memory_space<vmem>>, vector<1x128xf32>,
    %c1 = arith.constant 1 : index
    %c0_17 = arith.constant 0 : index
    %36 = vector.load %arg4[%c1, %c0_17] : memref<2x128xf32, #tpu.memory_space<vmem>>, vector<1x128xf32>
    %37 = arith.mulf %30, %30 : vector<32x128xf32>
    %cst_18 = arith.constant dense<0.000000e+00> : vector<128xf32>
    %38 = vector.multi_reduction <add>, %37, %cst_18 [0] : vector<32x128xf32> to vector<128xf32>
    %39 = vector.shape_cast %38 : vector<128xf32> to vector<1x128xf32>
    %40 = arith.addf %36, %39 : vector<1x128xf32>
    %c1_19 = arith.constant 1 : index
    %c0_20 = arith.constant 0 : index
    %41 = vector.load %arg4[%c1_19, %c0_20] : memref<2x128xf32, #tpu.memory_space<vmem>>, vector<1x128xf32>
    tpu.vector_store %arg4[%c1_19, %c0_20], %40 {strides = array<i32>} : memref<2x128xf32, #tpu.memory_space<vmem>>, vector<1x128xf32>,
    return
  }
  func.func @transform_0(%arg0: i32) -> (i32, i32) {
    %c0_i32 = arith.constant 0 : i32
    %c0_i32_0 = arith.constant 0 : i32
    return %arg0, %c0_i32 : i32, i32
  }
  func.func @transform_1(%arg0: i32) -> (i32, i32) {
    %c0_i32 = arith.constant 0 : i32
    %c0_i32_0 = arith.constant 0 : i32
    %c0_i32_1 = arith.constant 0 : i32
    return %c0_i32, %c0_i32_0 : i32, i32
  }
  func.func @transform_2(%arg0: i32) -> (i32, i32) {
    %c0_i32 = arith.constant 0 : i32
    %c0_i32_0 = arith.constant 0 : i32
    %c0_i32_1 = arith.constant 0 : i32
    return %c0_i32, %c0_i32_0 : i32, i32
  }
  func.func @transform_3(%arg0: i32) -> (i32, i32) {
    %c0_i32 = arith.constant 0 : i32
    %c0_i32_0 = arith.constant 0 : i32
    %c0_i32_1 = arith.constant 0 : i32
    return %c0_i32, %c0_i32_0 : i32, i32
  }
}

</mosaic_0001>

<bundles_post_ra>
// kernel: tpu_custom_call.1
= control target key start
LH: loop header
LB: loop body
LE: loop exit
PB: predicated region body
PF: predicated region fallthrough
CT: control target
= control target key end

     0   :  { %8 = vsyncpa [#allocation3], 0  ;;  %s505_s12 = smov 0   ;;  %s542_s0 = inlined_call_operand.vmem [shape: f32[512,4], index: 0, kind: input, shape index: {}]   ;;  %s543_s1 = inlined_call_operand.vmem [shape: f32[4,128], index: 1, kind: input, shape index: {}]   ;;  %s544_s2 = inlined_call_operand.vmem [shape: f32[1,128], index: 2, kind: input, shape index: {}]   ;;  %s545_s3 = inlined_call_operand.hbm [shape: f32[2,128], index: 3, kind: output, shape index: {}]  }
   0x1 LB: > { %s511_s13 = sadd.s32 4294967295, %s481_s12   ;;  %p398_p0 = scmp.ge.s32.totalorder %s481_s12, 1  ;;  %s481_s12 = sphi %s505_s12, %s14_s12  }
   0x2   : > { %p134_p1 = scmp.lt.s32.totalorder %s481_s12, 17 }
   0x4   : > { %p135_p2 = pnand %p398_p0, %p134_p1 }
   0x5   : > { %s399_s14 = sshll.u32 (!%p135_p2), %s511_s13, 2  ;;  %p401_p4 = scmp.ne.s32.totalorder (!%p135_p2), %s511_s13, 0 }
   0x6   : > { %138 = sbr.rel (%p135_p2) target bundleno = 249 (0xf9), region = 32  ;;  %p154_p3 = scmp.lt.s32.totalorder (!%p135_p2), %s399_s14, 63 }
   0xb   : > { %s547_s14 = smov (!%p154_p3, %s399_s14), 63  ;;  %162 = sbr.rel (%p401_p4) target bundleno = 18 (0x12), region = 36 }
   0xc   : > { %s400_s15 = sshll.u32 %s547_s14, 3 }
   0xd   : > { %s157_s18 = scalar_lea.vmem %s542_s0, %s400_s15 }
  0x10   : > { %v483_v0 = vmov 0.0  }
  0x11   : > { %163 = vst [vmem:[#allocation2] sm:$0x3] %v483_v0 }
  0x12 PF: > { %v168_v1 = vld [vmem:[%s543_s1] sm:$0xf]  ;;  %vm189_vm0 = vcmask 1043456   ;;  %vm176_vm1 = vcmask 31744   ;;  %v166_v3 = vld [vmem:[%s157_s18 + $0x10] sm:$0xff]  ;;  %v165_v4 = vld [vmem:[%s157_s18 + $0x8] sm:$0xff]  ;;  %v295_v6 = vlaneseq }
  0x13   : > { %v164_v2 = vld [vmem:[%s157_s18] sm:$0xff]  ;;  %421 = vmatprep.subr.msk.mxu0 %vm189_vm0, %v168_v1  ;;  %429 = vmatprep.subr.msk.mxu1 %vm189_vm0, %v168_v1  ;;  %v167_v5 = vld [vmem:[%s157_s18 + $0x18] sm:$0xff]  ;;  %s408_s21 = sshll.u32 %s511_s13, 5  ;;  %s484_s29 = smov [#allocation2]  }
  0x14   : > { %422 = vmatpush3.msk.msra.mxu0 %vm189_vm0, %v168_v1  ;;  %430 = vmatpush3.msk.msra.mxu1 %vm189_vm0, %v168_v1  ;;  %s284_s22 = ssub.s32 0, %s408_s21  ;;  %p283_p5 = scmp.lt.s32.totalorder %s408_s21, 0  ;;  %v296_v7 = vshrl.u32 %v295_v6, 7  ;;  %v402_v11 = vld [vmem:[%s544_s2] ss:$0 sm:$0xff] }
  0x15   : > { %423 = vmatprep.mubr.msk.f32.mxu0 %vm176_vm1, %v164_v2  ;;  %426 = vmatprep.mubr.msk.f32.mxu1 %vm176_vm1, %v166_v3  ;;  %s409_s23 = smin.u32 %s408_s21, %s284_s22  ;;  %s356_s30 = sshll.u32 %s484_s29, 4  ;;  %s357_s30 = int_to_ptr.vmem [resolvable:$true] %s356_s30 }
  0x16   : > { %424 = vmatmul.mubr.msk.f32.vlgmr.msra.gmra.mxu0 %vm176_vm1, %v165_v4  ;;  %427 = vmatmul.mubr.msk.f32.vlgmr.msra.gmra.mxu1 %vm176_vm1, %v167_v5  ;;  %s286_s24 = sand.u32 127, %s409_s23   ;;  %v297_v8 = vadd.s32 8, %v296_v7  ;;  %v298_v10 = vadd.s32 16, %v296_v7  ;;  %v299_v13 = vadd.s32 24, %v296_v7  ;;  %p435_p7 = scmp.eq.s32.totalorder %s511_s13, 15 }
  0x17   : > { %s287_s25 = ssub.s32 0, %s286_s24  ;;  %s447_s4 = scalar_lea.vmem %s357_s30, 32 }
  0x18   : > { %s549_s25 = smov (!%p283_p5, %s287_s25), %s286_s24  ;;  %v321_v52 = vld [vmem:[#allocation2] sm:$0x1]  ;;  %v333_v55 = vld [vmem:[#allocation2 + $0x1] sm:$0x1]  ;;  %p448_p8 = scmp.ne.s32.totalorder %s357_s30, %s447_s4 }
  0x19   : > { %p411_p6 = scmp.lt.s32.totalorder %s549_s25, 0  ;;  %s293_s26 = sadd.s32 128, %s549_s25 }
  0x1a   : > { %p449_p9 = pnand %p448_p8, %p435_p7  ;;  %p454_p11 = scmp.lt.s32.totalorder %s357_s30, %s357_s30 }
  0x1b   : > { %s551_s26 = smov (!%p411_p6, %s293_s26), %s549_s25  ;;  %p455_p12 = scmp.lt.s32.totalorder %s447_s4, %s447_s4 }
  0x1c   : > { %v300_v9 = vstv %s551_s26  ;;  %p450_p10 = pneg %p449_p9 }
  0x1d   : > { %v302_v12 = vadd.s32 %v300_v9, %v297_v8  ;;  %v301_v16 = vadd.s32 %v300_v9, %v296_v7  ;;  %v303_v17 = vadd.s32 %v300_v9, %v298_v10  ;;  %v304_v20 = vadd.s32 %v300_v9, %v299_v13  ;;  %p456_p13 = por %p455_p12, %p454_p11 }
  0x1f   : > { %vm306_vm2 = vcmp.lt.s32.totalorder %v302_v12, 100  ;;  %vm305_vm3 = vcmp.lt.s32.totalorder %v301_v16, 100  ;;  %vm307_vm4 = vcmp.lt.s32.totalorder %v303_v17, 100  ;;  %vm308_vm5 = vcmp.lt.s32.totalorder %v304_v20, 100  ;;  %p457_p0 = pnand %p456_p13, %p450_p10 }
  0xd6   : > { %v425_v14 = vpop.f32.mrf.mxu0  ;;  %v428_v15 = vpop.f32.mrf.mxu1 }
  0xd7   : > { %v265_v18 = vadd.f32 %v425_v14, %v402_v11  ;;  %v275_v19 = vadd.f32 %v428_v15, %v402_v11 }
  0xd8   : > { %v259_v21 = vpop.f32.mrf.mxu0  ;;  %v269_v22 = vpop.f32.mrf.mxu1 }
  0xd9   : > { %v279_v23 = vmax.f32 %v265_v18, 0.0  ;;  %v260_v24 = vadd.f32 %v402_v11, %v259_v21  ;;  %v270_v25 = vadd.f32 %v402_v11, %v269_v22  ;;  %v281_v27 = vmax.f32 %v275_v19, 0.0 }
  0xdb   : > { %v318_v26 = vsel %vm306_vm2, %v279_v23, 0.0  ;;  %v278_v28 = vmax.f32 %v260_v24, 0.0  ;;  %v280_v29 = vmax.f32 %v270_v25, 0.0  ;;  %v320_v35 = vsel %vm308_vm5, %v281_v27, 0.0 }
  0xdc   : > { %v335_v32 = vmul.f32 %v318_v26, %v318_v26  ;;  %v337_v39 = vmul.f32 %v320_v35, %v320_v35 }
  0xdd   : > { %v317_v30 = vsel %vm305_vm3, %v278_v28, 0.0  ;;  %v319_v31 = vsel %vm307_vm4, %v280_v29, 0.0 }
  0xde   : > { %v322_v33 = vadd.f32 %v318_v26, %v317_v30  ;;  %v334_v34 = vmul.f32 %v317_v30, %v317_v30  ;;  %v336_v38 = vmul.f32 %v319_v31, %v319_v31 }
  0xe0   : > { %v338_v36 = vadd.f32 %v335_v32, %v334_v34  ;;  %v323_v37 = vadd.f32 %v322_v33, %v319_v31 }
  0xe2   : > { %v324_v40 = vadd.f32 %v323_v37, %v320_v35  ;;  %v339_v41 = vadd.f32 %v338_v36, %v336_v38 }
  0xe4   : > { %v325_v42 = vrot.slane %v324_v40, 4  ;;  %v340_v43 = vadd.f32 %v339_v41, %v337_v39 }
  0xe6   : > { %v326_v44 = vadd.f32 %v325_v42, %v324_v40  ;;  %v341_v45 = vrot.slane %v340_v43, 4 }
  0xe8   : > { %v327_v46 = vrot.slane %v326_v44, 2  ;;  %v342_v47 = vadd.f32 %v341_v45, %v340_v43 }
  0xea   : > { %v328_v48 = vadd.f32 %v327_v46, %v326_v44  ;;  %v343_v49 = vrot.slane %v342_v47, 2 }
  0xec   : > { %v329_v50 = vrot.slane %v328_v48, 1  ;;  %v344_v51 = vadd.f32 %v343_v49, %v342_v47 }
  0xee   : > { %v330_v53 = vadd.f32 %v329_v50, %v328_v48  ;;  %v345_v54 = vrot.slane %v344_v51, 1 }
  0xf0   : > { %v331_v56 = vadd.f32 %v330_v53, %v321_v52  ;;  %v346_v57 = vadd.f32 %v345_v54, %v344_v51 }
  0xf2   : > { %332 = vst [vmem:[#allocation2] sm:$0x1] %v331_v56  ;;  %v347_v58 = vadd.f32 %v346_v57, %v333_v55 }
  0xf4   : > { %348 = vst [vmem:[#allocation2 + $0x1] sm:$0x1] %v347_v58 }
  0xf5   : > { %460 = shalt.err (!%p457_p0)
}
  0xf6   : > { %432 = dma.vmem_to_hbm [thread:$0]  (%p435_p7), %s357_s30, 32, %s545_s3, [#allocation3]  }
  0xf7   : > { %476 = dma.done.wait (%p435_p7), [#allocation3], 32  }
  0xf8   : > { %478 = vsyncadd (%p435_p7), [#allocation3], 4294967264 }
  0xf9 PF: > { %s14_s12 = sadd.s32 1, %s481_s12  }
  0xfa   : > { %p11_p1 = scmp.ge.s32.totalorder %s14_s12, 18  }
  0xfc   :  { %13 = sbr.rel (!%p11_p1) target bundleno = 1 (0x1), region = 63 }
 0x101   :  { %369 = vsyncpa [#allocation3], 1 }
 0x102   :  { %371 = vsyncpa [#allocation3 + $0x1], 1 }

</bundles_post_ra>
